<compile_context>
chip_gen: v5e
topology: v5e:2x2
jax: 0.10.0
libtpu: 0.0.40
codegen_flags: <defaults>
</compile_context>

<pallas_src>
import numpy as np
import jax
import jax.numpy as jnp
from jax import lax
from jax.experimental import pallas as pl
from jax.experimental.pallas import tpu as pltpu

# Small shapes consistent with the module's interface.
B, T, S, D, H, F, C, DV = 2, 8, 8, 32, 32, 64, 4, 16
BT, BS = B * T, B * S
HEAD_W = 128                      # lane-dense packed head width (>= D + C + DV = 52)
_SCALE = float(1.0 / np.sqrt(H))


def model_kernel(syn_ref, seq_ref, emb_ref, pad_ref,
                 w_in_ref, w_syn_ref, wq_ref, w_kv_ref, w1_ref, w_head_ref,
                 out_ref):
    # Whole batch in one invocation; (B, T) flattened for all weight matmuls.
    seq = seq_ref[...]                       # (BT, D)
    emb = emb_ref[...]                       # (BS, D)
    pad = pad_ref[...]                       # (B, S)   1.0 where padded

    # Syntax one-hot built in-kernel (compare against lane iota).
    syn = syn_ref[...]                       # (BT, 1) int32
    onehot = (syn == lax.broadcasted_iota(jnp.int32, (BT, C), 1)).astype(jnp.float32)

    # Token projection + syntax embedding.
    h = (jnp.dot(seq, w_in_ref[...], preferred_element_type=jnp.float32)
         + jnp.dot(onehot, w_syn_ref[...], preferred_element_type=jnp.float32))      # (BT, H)

    # Fused K|V projection of in_embs, single matmul.
    q = jnp.dot(h, wq_ref[...], preferred_element_type=jnp.float32)                  # (BT, H)
    kv = jnp.dot(emb, w_kv_ref[...], preferred_element_type=jnp.float32)             # (BS, 2H)
    k = kv[:, :H]                                                                    # (BS, H)
    v = kv[:, H:]                                                                    # (BS, H)

    # Masked cross-attention: per-batch path, unrolled over B=2.
    ctx_parts = []
    for b in range(B):
        q_b = q[b * T:(b + 1) * T]           # (T, H)
        k_b = k[b * S:(b + 1) * S]           # (S, H)
        v_b = v[b * S:(b + 1) * S]           # (S, H)
        # Contract on H directly (no k transpose / XLU copy).
        scores = lax.dot_general(q_b, k_b, (((1,), (1,)), ((), ())),
                                 preferred_element_type=jnp.float32)                 # (T, S)
        scores = scores * _SCALE + pad[b:b + 1, :] * (-1e9)
        m = jnp.max(scores, axis=-1, keepdims=True)
        e = jnp.exp(scores - m)
        inv = pl.reciprocal(jnp.sum(e, axis=-1, keepdims=True), approx=True)
        attn = e * inv
        ctx_parts.append(jnp.dot(attn, v_b, preferred_element_type=jnp.float32))     # (T, H)
    ctx = jnp.concatenate(ctx_parts, axis=0)                                         # (BT, H)

    # Feed-forward.
    f = jnp.maximum(jnp.dot(h + ctx, w1_ref[...],
                            preferred_element_type=jnp.float32), 0.0)                # (BT, F)

    # Fused heads (out | cls | var | zero-pad): one matmul, one lane-dense store.
    out_ref[...] = jnp.dot(f, w_head_ref[...], preferred_element_type=jnp.float32)   # (BT, 128)


def make_params(key):
    ks = jax.random.split(key, 9)

    def init(k, shape, fan_in):
        return (jax.random.normal(k, shape, dtype=jnp.float32) / np.sqrt(fan_in)).astype(jnp.float32)

    return dict(
        w_in=init(ks[0], (D, H), D),
        w_syn=init(ks[1], (C, H), C),
        wq=init(ks[2], (H, H), H),
        wk=init(ks[3], (D, H), D),
        wv=init(ks[4], (D, H), D),
        w1=init(ks[5], (H, F), H),
        w_out=init(ks[6], (F, D), F),
        w_cls=init(ks[7], (F, C), F),
        w_var=init(ks[8], (F, DV), F),
    )


def fuse_params(params):
    """One-time weight prep: fuse K|V and the three heads (zero-padded to 128 lanes)."""
    w_kv = jnp.concatenate([params["wk"], params["wv"]], axis=1)                      # (D, 2H)
    pad_cols = HEAD_W - (D + C + DV)
    w_head = jnp.concatenate(
        [params["w_out"], params["w_cls"], params["w_var"],
         jnp.zeros((F, pad_cols), jnp.float32)], axis=1)                              # (F, 128)
    return dict(w_in=params["w_in"], w_syn=params["w_syn"], wq=params["wq"],
                w_kv=w_kv, w1=params["w1"], w_head=w_head)


def inference_forward(seq, seq_syntax, in_embs, mb_pad, fused):
    """Pallas implementation of forward(seq, seq_syntax, in_embs, mb_pad)."""
    seq_f = seq.reshape(BT, D)
    syn_f = seq_syntax.reshape(BT, 1).astype(jnp.int32)
    emb_f = in_embs.reshape(BS, D)
    pad = mb_pad.astype(jnp.float32)                                                  # (B, S)

    def full(shape):
        return pl.BlockSpec(shape, lambda i: (0, 0))

    in_specs = [
        full((BT, 1)),          # seq_syntax (int32)
        full((BT, D)),          # seq
        full((BS, D)),          # in_embs
        full((B, S)),           # pad mask
        full((D, H)),           # w_in
        full((C, H)),           # w_syn
        full((H, H)),           # wq
        full((D, 2 * H)),       # w_kv (fused)
        full((H, F)),           # w1
        full((F, HEAD_W)),      # w_head (fused, lane-padded)
    ]
    out_specs = full((BT, HEAD_W))
    out_shape = jax.ShapeDtypeStruct((BT, HEAD_W), jnp.float32)

    packed = pl.pallas_call(
        model_kernel,
        grid=(1,),
        in_specs=in_specs,
        out_specs=out_specs,
        out_shape=out_shape,
        compiler_params=pltpu.CompilerParams(dimension_semantics=("arbitrary",)),
    )(syn_f, seq_f, emb_f, pad,
      fused["w_in"], fused["w_syn"], fused["wq"], fused["w_kv"],
      fused["w1"], fused["w_head"])

    packed = packed.reshape(B, T, HEAD_W)
    outs = packed[..., :D]
    cls_logits = packed[..., D:D + C]
    var_emb = packed[..., D + C:D + C + DV]
    return outs, cls_logits, var_emb


def reference_forward(seq, seq_syntax, in_embs, mb_pad, params):
    """Plain-JAX reference for correctness checking (uses unfused params)."""
    syn = jax.nn.one_hot(seq_syntax, C, dtype=jnp.float32)
    pad = mb_pad.astype(jnp.float32)[:, None, :]
    h = seq @ params["w_in"] + syn @ params["w_syn"]
    q = h @ params["wq"]
    k = in_embs @ params["wk"]
    v = in_embs @ params["wv"]
    scores = jnp.einsum("bth,bsh->bts", q, k) / jnp.sqrt(jnp.float32(H)) + pad * (-1e9)
    attn = jax.nn.softmax(scores, axis=-1)
    ctx = jnp.einsum("bts,bsh->bth", attn, v)
    f = jnp.maximum((h + ctx) @ params["w1"], 0.0)
    return f @ params["w_out"], f @ params["w_cls"], f @ params["w_var"]


if __name__ == "__main__":
    key = jax.random.PRNGKey(0)
    k_seq, k_emb, k_syn, k_par = jax.random.split(key, 4)

    seq = jax.random.normal(k_seq, (B, T, D), dtype=jnp.float32)
    in_embs = jax.random.normal(k_emb, (B, S, D), dtype=jnp.float32)
    seq_syntax = jax.random.randint(k_syn, (B, T), 0, C).astype(jnp.int32)
    mb_pad = jnp.zeros((B, S), dtype=jnp.bool_)   # matches torch.zeros(...).bool()

    params = make_params(k_par)
    fused = fuse_params(params)                   # one-time host-side weight fusion

    outs, cls_logits, var_emb = inference_forward(seq, seq_syntax, in_embs, mb_pad, fused)
    jax.block_until_ready((outs, cls_logits, var_emb))

    r_outs, r_cls, r_var = reference_forward(seq, seq_syntax, in_embs, mb_pad, params)
    # Tolerance loosened slightly: kernel uses EUP approximate reciprocal for the
    # softmax denominator (~1e-4 relative error).
    np.testing.assert_allclose(np.asarray(outs), np.asarray(r_outs), rtol=5e-3, atol=5e-3)
    np.testing.assert_allclose(np.asarray(cls_logits), np.asarray(r_cls), rtol=5e-3, atol=5e-3)
    np.testing.assert_allclose(np.asarray(var_emb), np.asarray(r_var), rtol=5e-3, atol=5e-3)

    print("KERNEL_OK")
</pallas_src>

<mosaic_0001>
module attributes {stable_mosaic.version = 11 : i64} {
  func.func @model_kernel(%arg0: i32, %arg1: memref<16x1xi32, #tpu.memory_space<vmem>>, %arg2: memref<16x32xf32, #tpu.memory_space<vmem>>, %arg3: memref<16x32xf32, #tpu.memory_space<vmem>>, %arg4: memref<2x8xf32, #tpu.memory_space<vmem>>, %arg5: memref<32x32xf32, #tpu.memory_space<vmem>>, %arg6: memref<4x32xf32, #tpu.memory_space<vmem>>, %arg7: memref<32x32xf32, #tpu.memory_space<vmem>>, %arg8: memref<32x64xf32, #tpu.memory_space<vmem>>, %arg9: memref<32x64xf32, #tpu.memory_space<vmem>>, %arg10: memref<64x128xf32, #tpu.memory_space<vmem>>, %arg11: memref<16x128xf32, #tpu.memory_space<vmem>>) attributes {dimension_semantics = [#tpu.dimension_semantics<arbitrary>], iteration_bounds = array<i64: 1>, scalar_prefetch = 0 : i64, scratch_operands = 0 : i64, tpu.core_type = #tpu.core_type<tc>, window_params = [{pipeline_mode = #tpu.pipeline_mode<synchronous>, transform_indices = @transform_0, window_bounds = array<i64: 16, 1>}, {pipeline_mode = #tpu.pipeline_mode<synchronous>, transform_indices = @transform_1, window_bounds = array<i64: 16, 32>}, {pipeline_mode = #tpu.pipeline_mode<synchronous>, transform_indices = @transform_2, window_bounds = array<i64: 16, 32>}, {pipeline_mode = #tpu.pipeline_mode<synchronous>, transform_indices = @transform_3, window_bounds = array<i64: 2, 8>}, {pipeline_mode = #tpu.pipeline_mode<synchronous>, transform_indices = @transform_4, window_bounds = array<i64: 32, 32>}, {pipeline_mode = #tpu.pipeline_mode<synchronous>, transform_indices = @transform_5, window_bounds = array<i64: 4, 32>}, {pipeline_mode = #tpu.pipeline_mode<synchronous>, transform_indices = @transform_6, window_bounds = array<i64: 32, 32>}, {pipeline_mode = #tpu.pipeline_mode<synchronous>, transform_indices = @transform_7, window_bounds = array<i64: 32, 64>}, {pipeline_mode = #tpu.pipeline_mode<synchronous>, transform_indices = @transform_8, window_bounds = array<i64: 32, 64>}, {pipeline_mode = #tpu.pipeline_mode<synchronous>, transform_indices = @transform_9, window_bounds = array<i64: 64, 128>}, {pipeline_mode = #tpu.pipeline_mode<synchronous>, transform_indices = @transform_10, window_bounds = array<i64: 16, 128>}]} {
    %c0 = arith.constant 0 : index
    %c0_0 = arith.constant 0 : index
    %0 = vector.load %arg2[%c0, %c0_0] : memref<16x32xf32, #tpu.memory_space<vmem>>, vector<16x32xf32>
    %c0_1 = arith.constant 0 : index
    %c0_2 = arith.constant 0 : index
    %1 = vector.load %arg3[%c0_1, %c0_2] : memref<16x32xf32, #tpu.memory_space<vmem>>, vector<16x32xf32>
    %c0_3 = arith.constant 0 : index
    %c0_4 = arith.constant 0 : index
    %2 = vector.load %arg4[%c0_3, %c0_4] : memref<2x8xf32, #tpu.memory_space<vmem>>, vector<2x8xf32>
    %c0_5 = arith.constant 0 : index
    %c0_6 = arith.constant 0 : index
    %3 = vector.load %arg1[%c0_5, %c0_6] : memref<16x1xi32, #tpu.memory_space<vmem>>, vector<16x1xi32>
    %4 = tpu.iota {dimensions = array<i32: 1>} : vector<16x4xi32>
    %5 = vector.broadcast %3 : vector<16x1xi32> to vector<16x4xi32>
    %6 = arith.cmpi eq, %5, %4 : vector<16x4xi32>
    %7 = arith.extui %6 : vector<16x4xi1> to vector<16x4xi32>
    %8 = arith.sitofp %7 : vector<16x4xi32> to vector<16x4xf32>
    %c0_7 = arith.constant 0 : index
    %c0_8 = arith.constant 0 : index
    %9 = vector.load %arg5[%c0_7, %c0_8] : memref<32x32xf32, #tpu.memory_space<vmem>>, vector<32x32xf32>
    %cst = arith.constant dense<0.000000e+00> : vector<16x32xf32>
    %10 = tpu.matmul %0, %9, %cst {dimension_numbers = #tpu.dot_dimension_numbers<[1], [0], [0], [1], [0, 0, 1, 1], [], []>} : vector<16x32xf32>, vector<32x32xf32>, vector<16x32xf32> -> vector<16x32xf32>
    %c0_9 = arith.constant 0 : index
    %c0_10 = arith.constant 0 : index
    %11 = vector.load %arg6[%c0_9, %c0_10] : memref<4x32xf32, #tpu.memory_space<vmem>>, vector<4x32xf32>
    %cst_11 = arith.constant dense<0.000000e+00> : vector<16x32xf32>
    %12 = tpu.matmul %8, %11, %cst_11 {dimension_numbers = #tpu.dot_dimension_numbers<[1], [0], [0], [1], [0, 0, 1, 1], [], []>} : vector<16x4xf32>, vector<4x32xf32>, vector<16x32xf32> -> vector<16x32xf32>
    %13 = arith.addf %10, %12 : vector<16x32xf32>
    %c0_12 = arith.constant 0 : index
    %c0_13 = arith.constant 0 : index
    %14 = vector.load %arg7[%c0_12, %c0_13] : memref<32x32xf32, #tpu.memory_space<vmem>>, vector<32x32xf32>
    %cst_14 = arith.constant dense<0.000000e+00> : vector<16x32xf32>
    %15 = tpu.matmul %13, %14, %cst_14 {dimension_numbers = #tpu.dot_dimension_numbers<[1], [0], [0], [1], [0, 0, 1, 1], [], []>} : vector<16x32xf32>, vector<32x32xf32>, vector<16x32xf32> -> vector<16x32xf32>
    %c0_15 = arith.constant 0 : index
    %c0_16 = arith.constant 0 : index
    %16 = vector.load %arg8[%c0_15, %c0_16] : memref<32x64xf32, #tpu.memory_space<vmem>>, vector<32x64xf32>
    %cst_17 = arith.constant dense<0.000000e+00> : vector<16x64xf32>
    %17 = tpu.matmul %1, %16, %cst_17 {dimension_numbers = #tpu.dot_dimension_numbers<[1], [0], [0], [1], [0, 0, 1, 1], [], []>} : vector<16x32xf32>, vector<32x64xf32>, vector<16x64xf32> -> vector<16x64xf32>
    %18 = vector.extract_strided_slice %17 {offsets = [0, 0], sizes = [16, 32], strides = [1, 1]} : vector<16x64xf32> to vector<16x32xf32>
    %19 = vector.extract_strided_slice %17 {offsets = [0, 32], sizes = [16, 32], strides = [1, 1]} : vector<16x64xf32> to vector<16x32xf32>
    %20 = vector.extract_strided_slice %15 {offsets = [0, 0], sizes = [8, 32], strides = [1, 1]} : vector<16x32xf32> to vector<8x32xf32>
    %21 = vector.extract_strided_slice %18 {offsets = [0, 0], sizes = [8, 32], strides = [1, 1]} : vector<16x32xf32> to vector<8x32xf32>
    %22 = vector.extract_strided_slice %19 {offsets = [0, 0], sizes = [8, 32], strides = [1, 1]} : vector<16x32xf32> to vector<8x32xf32>
    %cst_18 = arith.constant dense<0.000000e+00> : vector<8x8xf32>
    %23 = tpu.matmul %20, %21, %cst_18 {dimension_numbers = #tpu.dot_dimension_numbers<[1], [1], [0], [0], [0, 0, 1, 0], [], []>} : vector<8x32xf32>, vector<8x32xf32>, vector<8x8xf32> -> vector<8x8xf32>
    %cst_19 = arith.constant 0.176776692 : f32
    %24 = vector.broadcast %cst_19 : f32 to vector<8x8xf32>
    %25 = arith.mulf %23, %24 : vector<8x8xf32>
    %26 = vector.extract_strided_slice %2 {offsets = [0, 0], sizes = [1, 8], strides = [1, 1]} : vector<2x8xf32> to vector<1x8xf32>
    %cst_20 = arith.constant -1.000000e+09 : f32
    %27 = vector.broadcast %cst_20 : f32 to vector<1x8xf32>
    %28 = arith.mulf %26, %27 : vector<1x8xf32>
    %29 = vector.broadcast %28 : vector<1x8xf32> to vector<8x8xf32>
    %30 = arith.addf %25, %29 : vector<8x8xf32>
    %cst_21 = arith.constant dense<0xFF800000> : vector<8xf32>
    %31 = vector.multi_reduction <maximumf>, %30, %cst_21 [1] : vector<8x8xf32> to vector<8xf32>
    %32 = vector.shape_cast %31 : vector<8xf32> to vector<8x1xf32>
    %33 = vector.broadcast %32 : vector<8x1xf32> to vector<8x8xf32>
    %34 = arith.subf %30, %33 : vector<8x8xf32>
    %35 = math.exp %34 : vector<8x8xf32>
    %cst_22 = arith.constant dense<0.000000e+00> : vector<8xf32>
    %36 = vector.multi_reduction <add>, %35, %cst_22 [1] : vector<8x8xf32> to vector<8xf32>
    %37 = vector.shape_cast %36 : vector<8xf32> to vector<8x1xf32>
    %38 = tpu.reciprocal %37 {approx = true} : vector<8x1xf32> -> vector<8x1xf32>
    %39 = vector.broadcast %38 : vector<8x1xf32> to vector<8x8xf32>
    %40 = arith.mulf %35, %39 : vector<8x8xf32>
    %cst_23 = arith.constant dense<0.000000e+00> : vector<8x32xf32>
    %41 = tpu.matmul %40, %22, %cst_23 {dimension_numbers = #tpu.dot_dimension_numbers<[1], [0], [0], [1], [0, 0, 1, 1], [], []>} : vector<8x8xf32>, vector<8x32xf32>, vector<8x32xf32> -> vector<8x32xf32>
    %42 = vector.extract_strided_slice %15 {offsets = [8, 0], sizes = [8, 32], strides = [1, 1]} : vector<16x32xf32> to vector<8x32xf32>
    %43 = vector.extract_strided_slice %18 {offsets = [8, 0], sizes = [8, 32], strides = [1, 1]} : vector<16x32xf32> to vector<8x32xf32>
    %44 = vector.extract_strided_slice %19 {offsets = [8, 0], sizes = [8, 32], strides = [1, 1]} : vector<16x32xf32> to vector<8x32xf32>
    %cst_24 = arith.constant dense<0.000000e+00> : vector<8x8xf32>
    %45 = tpu.matmul %42, %43, %cst_24 {dimension_numbers = #tpu.dot_dimension_numbers<[1], [1], [0], [0], [0, 0, 1, 0], [], []>} : vector<8x32xf32>, vector<8x32xf32>, vector<8x8xf32> -> vector<8x8xf32>
    %cst_25 = arith.constant 0.176776692 : f32
    %46 = vector.broadcast %cst_25 : f32 to vector<8x8xf32>
    %47 = arith.mulf %45, %46 : vector<8x8xf32>
    %48 = vector.extract_strided_slice %2 {offsets = [1, 0], sizes = [1, 8], strides = [1, 1]} : vector<2x8xf32> to vector<1x8xf32>
    %cst_26 = arith.constant -1.000000e+09 : f32
    %49 = vector.broadcast %cst_26 : f32 to vector<1x8xf32>
    %50 = arith.mulf %48, %49 : vector<1x8xf32>
    %51 = vector.broadcast %50 : vector<1x8xf32> to vector<8x8xf32>
    %52 = arith.addf %47, %51 : vector<8x8xf32>
    %cst_27 = arith.constant dense<0xFF800000> : vector<8xf32>
    %53 = vector.multi_reduction <maximumf>, %52, %cst_27 [1] : vector<8x8xf32> to vector<8xf32>
    %54 = vector.shape_cast %53 : vector<8xf32> to vector<8x1xf32>
    %55 = vector.broadcast %54 : vector<8x1xf32> to vector<8x8xf32>
    %56 = arith.subf %52, %55 : vector<8x8xf32>
    %57 = math.exp %56 : vector<8x8xf32>
    %cst_28 = arith.constant dense<0.000000e+00> : vector<8xf32>
    %58 = vector.multi_reduction <add>, %57, %cst_28 [1] : vector<8x8xf32> to vector<8xf32>
    %59 = vector.shape_cast %58 : vector<8xf32> to vector<8x1xf32>
    %60 = tpu.reciprocal %59 {approx = true} : vector<8x1xf32> -> vector<8x1xf32>
    %61 = vector.broadcast %60 : vector<8x1xf32> to vector<8x8xf32>
    %62 = arith.mulf %57, %61 : vector<8x8xf32>
    %cst_29 = arith.constant dense<0.000000e+00> : vector<8x32xf32>
    %63 = tpu.matmul %62, %44, %cst_29 {dimension_numbers = #tpu.dot_dimension_numbers<[1], [0], [0], [1], [0, 0, 1, 1], [], []>} : vector<8x8xf32>, vector<8x32xf32>, vector<8x32xf32> -> vector<8x32xf32>
    %64 = tpu.concatenate %41, %63 in 0 : vector<8x32xf32>, vector<8x32xf32> -> vector<16x32xf32>
    %65 = arith.addf %13, %64 : vector<16x32xf32>
    %c0_30 = arith.constant 0 : index
    %c0_31 = arith.constant 0 : index
    %66 = vector.load %arg9[%c0_30, %c0_31] : memref<32x64xf32, #tpu.memory_space<vmem>>, vector<32x64xf32>
    %cst_32 = arith.constant dense<0.000000e+00> : vector<16x64xf32>
    %67 = tpu.matmul %65, %66, %cst_32 {dimension_numbers = #tpu.dot_dimension_numbers<[1], [0], [0], [1], [0, 0, 1, 1], [], []>} : vector<16x32xf32>, vector<32x64xf32>, vector<16x64xf32> -> vector<16x64xf32>
    %cst_33 = arith.constant 0.000000e+00 : f32
    %68 = vector.broadcast %cst_33 : f32 to vector<16x64xf32>
    %69 = arith.maximumf %67, %68 : vector<16x64xf32>
    %c0_34 = arith.constant 0 : index
    %c0_35 = arith.constant 0 : index
    %70 = vector.load %arg10[%c0_34, %c0_35] : memref<64x128xf32, #tpu.memory_space<vmem>>, vector<64x128xf32>
    %cst_36 = arith.constant dense<0.000000e+00> : vector<16x128xf32>
    %71 = tpu.matmul %69, %70, %cst_36 {dimension_numbers = #tpu.dot_dimension_numbers<[1], [0], [0], [1], [0, 0, 1, 1], [], []>} : vector<16x64xf32>, vector<64x128xf32>, vector<16x128xf32> -> vector<16x128xf32>
    %c0_37 = arith.constant 0 : index
    %c0_38 = arith.constant 0 : index
    %72 = vector.load %arg11[%c0_37, %c0_38] : memref<16x128xf32, #tpu.memory_space<vmem>>, vector<16x128xf32>
    tpu.vector_store %arg11[%c0_37, %c0_38], %71 {strides = array<i32>} : memref<16x128xf32, #tpu.memory_space<vmem>>, vector<16x128xf32>,
    return
  }
  func.func @transform_0(%arg0: i32) -> (i32, i32) {
    %c0_i32 = arith.constant 0 : i32
    %c0_i32_0 = arith.constant 0 : i32
    %c0_i32_1 = arith.constant 0 : i32
    return %c0_i32, %c0_i32_0 : i32, i32
  }
  func.func @transform_1(%arg0: i32) -> (i32, i32) {
    %c0_i32 = arith.constant 0 : i32
    %c0_i32_0 = arith.constant 0 : i32
    %c0_i32_1 = arith.constant 0 : i32
    return %c0_i32, %c0_i32_0 : i32, i32
  }
  func.func @transform_2(%arg0: i32) -> (i32, i32) {
    %c0_i32 = arith.constant 0 : i32
    %c0_i32_0 = arith.constant 0 : i32
    %c0_i32_1 = arith.constant 0 : i32
    return %c0_i32, %c0_i32_0 : i32, i32
  }
  func.func @transform_3(%arg0: i32) -> (i32, i32) {
    %c0_i32 = arith.constant 0 : i32
    %c0_i32_0 = arith.constant 0 : i32
    %c0_i32_1 = arith.constant 0 : i32
    return %c0_i32, %c0_i32_0 : i32, i32
  }
  func.func @transform_4(%arg0: i32) -> (i32, i32) {
    %c0_i32 = arith.constant 0 : i32
    %c0_i32_0 = arith.constant 0 : i32
    %c0_i32_1 = arith.constant 0 : i32
    return %c0_i32, %c0_i32_0 : i32, i32
  }
  func.func @transform_5(%arg0: i32) -> (i32, i32) {
    %c0_i32 = arith.constant 0 : i32
    %c0_i32_0 = arith.constant 0 : i32
    %c0_i32_1 = arith.constant 0 : i32
    return %c0_i32, %c0_i32_0 : i32, i32
  }
  func.func @transform_6(%arg0: i32) -> (i32, i32) {
    %c0_i32 = arith.constant 0 : i32
    %c0_i32_0 = arith.constant 0 : i32
    %c0_i32_1 = arith.constant 0 : i32
    return %c0_i32, %c0_i32_0 : i32, i32
  }
  func.func @transform_7(%arg0: i32) -> (i32, i32) {
    %c0_i32 = arith.constant 0 : i32
    %c0_i32_0 = arith.constant 0 : i32
    %c0_i32_1 = arith.constant 0 : i32
    return %c0_i32, %c0_i32_0 : i32, i32
  }
  func.func @transform_8(%arg0: i32) -> (i32, i32) {
    %c0_i32 = arith.constant 0 : i32
    %c0_i32_0 = arith.constant 0 : i32
    %c0_i32_1 = arith.constant 0 : i32
    return %c0_i32, %c0_i32_0 : i32, i32
  }
  func.func @transform_9(%arg0: i32) -> (i32, i32) {
    %c0_i32 = arith.constant 0 : i32
    %c0_i32_0 = arith.constant 0 : i32
    %c0_i32_1 = arith.constant 0 : i32
    return %c0_i32, %c0_i32_0 : i32, i32
  }
  func.func @transform_10(%arg0: i32) -> (i32, i32) {
    %c0_i32 = arith.constant 0 : i32
    %c0_i32_0 = arith.constant 0 : i32
    %c0_i32_1 = arith.constant 0 : i32
    return %c0_i32, %c0_i32_0 : i32, i32
  }
}

</mosaic_0001>

<bundles_post_ra>
// kernel: tpu_custom_call.1
= control target key start
LH: loop header
LB: loop body
LE: loop exit
PB: predicated region body
PF: predicated region fallthrough
CT: control target
= control target key end

     0   :  { %15 = vsyncpa [#allocation3], 0  ;;  %s934_s0 = inlined_call_operand.vmem [shape: s32[16,1], index: 0, kind: input, shape index: {}]   ;;  %s935_s1 = inlined_call_operand.vmem [shape: f32[16,32], index: 1, kind: input, shape index: {}]   ;;  %s936_s2 = inlined_call_operand.hbm [shape: f32[16,32], index: 2, kind: input, shape index: {}]   ;;  %s937_s3 = inlined_call_operand.hbm [shape: f32[2,8], index: 3, kind: input, shape index: {}]   ;;  %s938_s4 = inlined_call_operand.hbm [shape: f32[32,32], index: 4, kind: input, shape index: {}]   ;;  %s939_s5 = inlined_call_operand.vmem [shape: f32[4,32], index: 5, kind: input, shape index: {}]   ;;  %s940_s6 = inlined_call_operand.hbm [shape: f32[32,32], index: 6, kind: input, shape index: {}]   ;;  %s941_s7 = inlined_call_operand.hbm [shape: f32[32,64], index: 7, kind: input, shape index: {}]   ;;  %s942_s8 = inlined_call_operand.hbm [shape: f32[32,64], index: 8, kind: input, shape index: {}]   ;;  %s943_s9 = inlined_call_operand.hbm [shape: f32[64,128], index: 9, kind: input, shape index: {}]   ;;  %s944_s10 = inlined_call_operand.hbm [shape: f32[16,128], index: 10, kind: output, shape index: {}]  }
   0x1   :  { %16 = vsyncpa [#allocation6], 0 }
   0x2   :  { %17 = vsyncpa [#allocation9], 0 }
   0x3   :  { %18 = vsyncpa [#allocation12], 0  ;;  %s42_s15 = sshll.u32 %s937_s3, 4  ;;  %s43_s15 = int_to_ptr.hbm [resolvable:$true] %s42_s15 }
   0x4   :  { %19 = vsyncpa [#allocation4], 0  ;;  %s778_s16 = smov [#allocation5]   ;;  %s67_s20 = sshll.u32 %s940_s6, 4  ;;  %s68_s20 = int_to_ptr.hbm [resolvable:$true] %s67_s20 }
   0x5   :  { %s44_s17 = sshll.u32 %s778_s16, 4  ;;  %s779_s21 = smov [#allocation8]   ;;  %s45_s17 = int_to_ptr.vmem [resolvable:$true] %s44_s17 }
   0x6   :  { %47 = dma.hbm_to_vmem [thread:$0]  %s43_s15, 32, %s45_s17, [#allocation6]  }
   0x7   :  { %s69_s22 = sshll.u32 %s779_s21, 4  ;;  %s93_s25 = sshll.u32 %s942_s8, 4  ;;  %s70_s22 = int_to_ptr.vmem [resolvable:$true] %s69_s22  ;;  %s94_s25 = int_to_ptr.hbm [resolvable:$true] %s93_s25 }
   0x8   :  { %s780_s3 = smov 128   ;;  %s781_s26 = smov 8  }
   0x9   :  { %75 = dma.hbm_to_vmem [thread:$0]  %s68_s20, 512, %s70_s22, [#allocation9], %s780_s3, %s780_s3, %s781_s26  }
   0xa   :  { %s28_s29 = sshll.u32 %s936_s2, 4  ;;  %s782_s6 = smov [#allocation11]   ;;  %s29_s29 = int_to_ptr.hbm [resolvable:$true] %s28_s29 }
   0xb   :  { %s95_s30 = sshll.u32 %s782_s6, 4  ;;  %s783_s8 = smov [#allocation2]   ;;  %s96_s30 = int_to_ptr.vmem [resolvable:$true] %s95_s30 }
   0xc   :  { %101 = dma.hbm_to_vmem [thread:$0]  %s94_s25, 512, %s96_s30, [#allocation12], %s780_s3, %s780_s3, %s781_s26  }
   0xd   :  { %s30_s11 = sshll.u32 %s783_s8, 4  ;;  %s52_s14 = sshll.u32 %s938_s4, 4  ;;  %s31_s11 = int_to_ptr.vmem [resolvable:$true] %s30_s11  ;;  %s53_s14 = int_to_ptr.hbm [resolvable:$true] %s52_s14 }
   0xe   :  { %36 = dma.hbm_to_vmem [thread:$0]  %s29_s29, 256, %s31_s11, [#allocation3], %s780_s3, %s780_s3, %s781_s26  }
   0xf   :  { %s80_s16 = sshll.u32 %s941_s7, 4  ;;  %s784_s17 = smov [#allocation7]   ;;  %s81_s16 = int_to_ptr.hbm [resolvable:$true] %s80_s16 }
  0x10   :  { %s54_s18 = sshll.u32 %s784_s17, 4  ;;  %s785_s19 = smov [#allocation10]   ;;  %s55_s18 = int_to_ptr.vmem [resolvable:$true] %s54_s18 }
  0x11   :  { %60 = dma.hbm_to_vmem [thread:$0]  %s53_s14, 512, %s55_s18, [#allocation6], %s780_s3, %s780_s3, %s781_s26  }
  0x12   :  { %s82_s4 = sshll.u32 %s785_s19, 4  ;;  %s106_s22 = sshll.u32 %s943_s9, 4  ;;  %s83_s4 = int_to_ptr.vmem [resolvable:$true] %s82_s4  ;;  %s107_s22 = int_to_ptr.hbm [resolvable:$true] %s106_s22 }
  0x13   :  { %88 = dma.hbm_to_vmem [thread:$0]  %s81_s16, 512, %s83_s4, [#allocation9], %s780_s3, %s780_s3, %s781_s26  }
  0x14   :  { %s786_s7 = smov [#allocation13]  }
  0x15   :  { %s108_s23 = sshll.u32 %s786_s7, 4  ;;  %s109_s23 = int_to_ptr.vmem [resolvable:$true] %s108_s23 }
  0x16   :  { %114 = dma.hbm_to_vmem [thread:$0]  %s107_s22, 1024, %s109_s23, [#allocation12], %s780_s3, %s780_s3, %s781_s26  }
  0x17   :  { %768 = dma.done.wait [#allocation3], 256  }
  0x18   :  { %769 = vsyncadd [#allocation3], 4294967040 }
  0x19   :  { %770 = dma.done.wait [#allocation6], 544  }
  0x1a   :  { %771 = vsyncadd [#allocation6], 4294966752 }
  0x1b   :  { %772 = dma.done.wait [#allocation9], 1024  }
  0x1c   :  { %773 = vsyncadd [#allocation9], 4294966272 }
  0x1d   :  { %774 = dma.done.wait [#allocation12], 1536  }
  0x1e   :  { %775 = vsyncadd [#allocation12], 4294965760  ;;  %v787_v0 = vmov 0   ;;  %v148_v1 = vld [vmem:[%s934_s0] sm:$0xff]  ;;  %v167_v2 = vld [vmem:[#allocation7 + $0x18] sm:$0xff]  ;;  %vm176_vm0 = vcmask 1043456   ;;  %v150_v16 = vlaneseq }
  0x1f   :  { %567 = vset.pattern.permute.xlu0 %v787_v0  ;;  %222 = vmatpush.msra.mxu1 %v167_v2  ;;  %v166_v3 = vld [vmem:[#allocation7 + $0x10] sm:$0xff]  ;;  %v165_v4 = vld [vmem:[#allocation7 + $0x8] sm:$0xff]  ;;  %v164_v7 = vld [vmem:[#allocation7] sm:$0xff]  ;;  %vm203_vm1 = vcmask 261120   ;;  %vm169_vm2 = vcmask 31744   ;;  %v788_v19 = vmov 0.0  }
  0x20   :  { %153 = vperm.xlu0 %567, %v148_v1   ;;  %v149_v5 = vld [vmem:[%s934_s0 + $0x8] sm:$0xff]  ;;  %v168_v6 = vld [vmem:[%s939_s5] sm:$0xf]  ;;  %v266_v13 = vld [vmem:[#allocation10] sm:$0xff]  ;;  %v151_v17 = vand.u32 127, %v150_v16  ;;  %s789_s0 = smov 96  }
  0x21   :  { %223 = vmatpush.msra.mxu1 %v166_v3  ;;  %534 = vmatpush.msk.msra.mxu0 %vm176_vm0, %v168_v6  ;;  %v143_v8 = vld [vmem:[%s935_s1] sm:$0xff]  ;;  %v144_v9 = vld [vmem:[%s935_s1 + $0x8] sm:$0xff]  ;;  %v233_v25 = vld [vmem:[#allocation8] sm:$0xff]  ;;  %vm329_vm5 = vcmask 64512   ;;  %vm478_vm6 = vcmask 523264   ;;  %s790_s1 = smov [#allocation14]  }
  0x22   :  { %553 = vmatpush.msk.msra.mxu3 %vm176_vm0, %v168_v6  ;;  %v269_v10 = vld [vmem:[#allocation10 + $0x18] sm:$0xff]  ;;  %v268_v11 = vld [vmem:[#allocation10 + $0x10] sm:$0xff]  ;;  %v267_v12 = vld [vmem:[#allocation10 + $0x8] sm:$0xff]  ;;  %s514_s5 = sshll.u32 %s790_s1, 4  ;;  %s516_s14 = sshll.u32 %s944_s10, 4  ;;  %s515_s5 = int_to_ptr.vmem [resolvable:$true] %s514_s5  ;;  %s517_s14 = int_to_ptr.hbm [resolvable:$true] %s516_s14 }
  0x23   :  { %224 = vmatpush.msra.mxu1 %v165_v4  ;;  %v236_v14 = vld [vmem:[#allocation8 + $0x18] sm:$0xff]  ;;  %v235_v15 = vld [vmem:[#allocation8 + $0x10] sm:$0xff]  ;;  %v234_v24 = vld [vmem:[#allocation8 + $0x8] sm:$0xff] }
  0x24   :  { %288 = vmatpush.msrb.mxu3 %v269_v10  ;;  %255 = vmatpush.msra.mxu2 %v236_v14  ;;  %v145_v23 = vld [vmem:[#allocation2] sm:$0xff]  ;;  %v147_v35 = vld [vmem:[#allocation5] sm:$0x3]  ;;  %v146_v42 = vld [vmem:[#allocation2 + $0x8] sm:$0xff] }
  0x25   :  { %225 = vmatpush.msra.mxu1 %v164_v7  ;;  %v326_v36 = vmul.f32 -1e+09, %v147_v35  ;;  %v438_v53 = vld [vmem:[#allocation11 + $0x18] sm:$0xff]  ;;  %v437_v54 = vld [vmem:[#allocation11 + $0x10] sm:$0xff]  ;;  %v436_v56 = vld [vmem:[#allocation11 + $0x8] sm:$0xff] }
  0x26   :  { %537 = vmatmul.msk.f32.vlgmr.msra.gmra.mxu1 %vm203_vm1, %v143_v8  ;;  %289 = vmatpush.msrb.mxu3 %v268_v11  ;;  %v435_v57 = vld [vmem:[#allocation11] sm:$0xff]  ;;  %v477_v58 = vld [vmem:[#allocation13 + $0x38] sm:$0xff]  ;;  %v476_v59 = vld [vmem:[#allocation13 + $0x30] sm:$0xff] }
  0x27   :  { %256 = vmatpush.msra.mxu2 %v235_v15  ;;  %v327_v37 = vperm.slane %v326_v36, 0  ;;  %493 = vmatpush.msrb.mxu1 %v477_v58  ;;  %v475_v60 = vld [vmem:[#allocation13 + $0x28] sm:$0xff]  ;;  %v474_v61 = vld [vmem:[#allocation13 + $0x20] sm:$0xff]  ;;  %v473_v62 = vld [vmem:[#allocation13 + $0x18] sm:$0xff]  ;;  %v394_v2 = vperm.slane %v326_v36, 1 }
  0x28   :  { %156 = vperm.xlu0 %567, %v149_v5   ;;  %290 = vmatpush.msrb.mxu3 %v267_v12  ;;  %v472_v63 = vld [vmem:[#allocation13 + $0x10] sm:$0xff]  ;;  %v471_v7 = vld [vmem:[#allocation13 + $0x8] sm:$0xff]  ;;  %v470_v8 = vld [vmem:[#allocation13] sm:$0xff] }
  0x29   :  { %257 = vmatpush.msra.mxu2 %v234_v24  ;;  %494 = vmatpush.msrb.mxu1 %v476_v59 }
  0x2a   :  { %291 = vmatpush.msrb.mxu3 %v266_v13 }
  0x2b   :  { %258 = vmatpush.msra.mxu2 %v233_v25  ;;  %495 = vmatpush.msrb.mxu1 %v475_v60 }
  0x2d   :  { %496 = vmatpush.msrb.mxu1 %v474_v61 }
  0x2e   :  { %538 = vmatmul.msk.f32.gmra.mxu1 %vm203_vm1, %v144_v9 }
  0x2f   :  { %497 = vmatpush.msrb.mxu1 %v473_v62 }
  0x31   :  { %498 = vmatpush.msrb.mxu1 %v472_v63 }
  0x33   :  { %499 = vmatpush.msrb.mxu1 %v471_v7 }
  0x35   :  { %500 = vmatpush.msrb.mxu1 %v470_v8 }
  0x92   :  { %v154_v18 = vpop.permute.xlu0 %153 }
  0x93   :  { %vm158_vm3 = vcmp.eq.s32.totalorder %v154_v18, %v151_v17 }
  0x94   :  { %v532_v20 = vsel %vm158_vm3, 1.0, %v788_v19 }
  0x95   :  { %535 = vmatmul.msk.f32.vlgmr.msra.gmra.mxu0 %vm169_vm2, %v532_v20 }
  0x9a   :  { %v157_v21 = vpop.permute.xlu0 %156 }
  0x9b   :  { %vm159_vm4 = vcmp.eq.s32.totalorder %v157_v21, %v151_v17 }
  0x9c   :  { %v533_v22 = vsel %vm159_vm4, 1.0, %v788_v19 }
  0x9d   :  { %536 = vmatmul.msk.f32.vlgmr.msra.gmra.mxu3 %vm169_vm2, %v533_v22 }
  0xa3   :  { %v227_v26 = vpop.f32.mrf.mxu1 }
  0xa5   :  { %541 = vmatmul.msk.f32.vlgmr.msrb.gmra.mxu3 %vm203_vm1, %v145_v23 }
  0xab   :  { %v230_v29 = vpop.f32.mrf.mxu1 }
  0xad   :  { %542 = vmatmul.msk.f32.gmra.mxu3 %vm203_vm1, %v146_v42 }
 0x112   :  { %v197_v27 = vpop.f32.mrf.mxu0 }
 0x113   :  { %v903_v28 = vadd.f32 %v227_v26, %v197_v27 }
 0x115   :  { %539 = vmatmul.msk.f32.vlgmr.msra.gmra.mxu2 %vm203_vm1, %v903_v28 }
 0x120   :  { %v200_v30 = vpop.f32.mrf.mxu3 }
 0x121   :  { %v907_v31 = vadd.f32 %v230_v29, %v200_v30 }
 0x123   :  { %540 = vmatmul.msk.f32.gmra.mxu2 %vm203_vm1, %v907_v31 }
 0x128   :  { %v293_v32 = vpop.f32.mrf.mxu3 }
 0x129   :  { %341 = vrot.lane.b32.xlu2 %v293_v32, %s789_s0  ;;  %543 = vmatpush.xpose.msk.msrb.mxu0 %vm203_vm1, %v293_v32 }
 0x12d   :  { %457 = vmatpush.msra.mxu0 %v438_v53 }
 0x12f   :  { %458 = vmatpush.msra.mxu0 %v437_v54 }
 0x130   :  { %v296_v48 = vpop.f32.mrf.mxu3 }
 0x131   :  { %459 = vmatpush.msra.mxu0 %v436_v56 }
 0x133   :  { %460 = vmatpush.msra.mxu0 %v435_v57 }
 0x183   :  { %v342_v33 = vpop.permute.xlu2 %341 }
 0x184   :  { %362 = vmatpush.msrb.mxu2 %v342_v33 }
 0x186   :  { %546 = vmatpush.xpose.msk.msra.mxu2 %vm203_vm1, %v296_v48 }
 0x198   :  { %v260_v34 = vpop.f32.mrf.mxu2 }
 0x199   :  { %544 = vmatmul.msk.f32.vlgmr.msrb.gmra.mxu0 %vm203_vm1, %v260_v34 }
 0x1a6   :  { %v263_v52 = vpop.f32.mrf.mxu2 }
 0x216   :  { %v322_v38 = vpop.f32.mrf.mxu0 }
 0x217   :  { %v325_v39 = vmul.f32 0.17677669, %v322_v38 }
 0x219   :  { %v328_v40 = vadd.f32 %v327_v37, %v325_v39 }
 0x21b   :  { %v330_v41 = vsel %vm329_vm5, %v328_v40, -inf }
 0x21c   :  { %331 = vmax.xlane.f32.xlu1 %v330_v41 }
 0x28f   :  { %v332_v43 = vpop.xlane.xlu1 %331 }
 0x290   :  { %v333_v44 = vsub.f32 %v328_v40, %v332_v43 }
 0x292   :  { %v334_v45 = vmul.f32 1.442695, %v333_v44 }
 0x294   :  { %568 = vpow2.f32 %v334_v45 }
 0x29a   :  { %v569_v46 = vpop.eup %568 }
 0x29b   :  { %v336_v47 = vsel %vm329_vm5, %v569_v46, 0.0 }
 0x29c   :  { %337 = vadd.xlane.f32.xlu1 %v336_v47 }
 0x2b5   :  { %407 = vrot.lane.b32.xlu1 %v296_v48, %s789_s0 }
 0x30f   :  { %v338_v49 = vpop.xlane.xlu1 %337 }
 0x310   :  { %570 = vrcp.f32 %v338_v49 }
 0x316   :  { %v571_v50 = vpop.eup %570 }
 0x317   :  { %v340_v51 = vmul.f32 %v571_v50, %v569_v46 }
 0x319   :  { %545 = vmatmul.msk.f32.vlgmr.msrb.gmra.mxu2 %vm329_vm5, %v340_v51 }
 0x321   :  { %547 = vmatmul.msk.f32.vlgmr.msra.gmra.mxu2 %vm203_vm1, %v263_v52 }
 0x327   :  { %v408_v55 = vpop.permute.xlu1 %407 }
 0x328   :  { %428 = vmatpush.msra.mxu3 %v408_v55 }
 0x39c   :  { %v364_v0 = vpop.f32.mrf.mxu2 }
 0x39d   :  { %v433_v1 = vadd.f32 %v364_v0, %v903_v28 }
 0x39f   :  { %549 = vmatmul.msk.f32.vlgmr.msra.gmra.mxu0 %vm203_vm1, %v433_v1 }
 0x3a4   :  { %v390_v3 = vpop.f32.mrf.mxu2 }
 0x3a5   :  { %v393_v4 = vmul.f32 0.17677669, %v390_v3 }
 0x3a7   :  { %v395_v5 = vadd.f32 %v394_v2, %v393_v4 }
 0x3a9   :  { %v396_v6 = vsel %vm329_vm5, %v395_v5, -inf }
 0x3aa   :  { %397 = vmax.xlane.f32.xlu2 %v396_v6 }
 0x41c   :  { %v462_v9 = vpop.f32.mrf.mxu0 }
 0x41d   :  { %v468_v10 = vmax.f32 %v462_v9, 0.0  ;;  %v398_v11 = vpop.xlane.xlu2 %397 }
 0x41e   :  { %v399_v12 = vsub.f32 %v395_v5, %v398_v11 }
 0x41f   :  { %551 = vmatmul.msk.f32.vlgmr.msrb.gmra.mxu1 %vm478_vm6, %v468_v10 }
 0x420   :  { %v400_v13 = vmul.f32 1.442695, %v399_v12 }
 0x422   :  { %572 = vpow2.f32 %v400_v13 }
 0x428   :  { %v573_v14 = vpop.eup %572 }
 0x429   :  { %v402_v15 = vsel %vm329_vm5, %v573_v14, 0.0 }
 0x42a   :  { %403 = vadd.xlane.f32.xlu0 %v402_v15 }
 0x49c   :  { %v502_v16 = vpop.f32.mrf.mxu1 }
 0x49d   :  { %508 = vst [vmem:[#allocation14] sm:$0xff] %v502_v16  ;;  %v404_v17 = vpop.xlane.xlu0 %403 }
 0x49e   :  { %574 = vrcp.f32 %v404_v17 }
 0x4a4   :  { %v575_v18 = vpop.eup %574 }
 0x4a5   :  { %v406_v19 = vmul.f32 %v575_v18, %v573_v14 }
 0x4a7   :  { %548 = vmatmul.msk.f32.vlgmr.msra.gmra.mxu3 %vm329_vm5, %v406_v19 }
 0x52a   :  { %v430_v20 = vpop.f32.mrf.mxu3 }
 0x52b   :  { %v434_v21 = vadd.f32 %v430_v20, %v907_v31 }
 0x52d   :  { %550 = vmatmul.msk.f32.gmra.mxu0 %vm203_vm1, %v434_v21 }
 0x5aa   :  { %v465_v22 = vpop.f32.mrf.mxu0 }
 0x5ab   :  { %v469_v23 = vmax.f32 %v465_v22, 0.0 }
 0x5ad   :  { %552 = vmatmul.msk.f32.gmra.mxu1 %vm478_vm6, %v469_v23 }
 0x62a   :  { %v505_v24 = vpop.f32.mrf.mxu1 }
 0x62b   :  { %509 = vst [vmem:[#allocation14 + $0x8] sm:$0xff] %v505_v24 }
 0x62c   :  { %522 = dma.vmem_to_hbm [thread:$0]  %s515_s5, 256, %s517_s14, [#allocation4], %s780_s3, %s780_s3, %s781_s26  }
 0x62d   :  { %776 = dma.done.wait [#allocation4], 256  }
 0x62e   :  { %777 = vsyncadd [#allocation4], 4294967040 }
 0x62f   :  { %527 = vsyncpa [#allocation3], 1 }
 0x630   :  { %528 = vsyncpa [#allocation6], 1 }
 0x631   :  { %529 = vsyncpa [#allocation9], 1 }
 0x632   :  { %530 = vsyncpa [#allocation12], 1 }
 0x633   :  { %531 = vsyncpa [#allocation4], 1 }

</bundles_post_ra>
